<compile_context>
chip_gen: v7x
topology: tpu7x:2x2x1
jax: 0.10.0
libtpu: 0.0.40
codegen_flags: <defaults>
</compile_context>

<pallas_src>
import numpy as np
import jax
import jax.numpy as jnp
from jax import lax
from jax.experimental import pallas as pl
from jax.experimental.pallas import tpu as pltpu


# ---------------------------------------------------------------------------
# Constant (shift-folded) DFT operators, built once in numpy at trace time.
# ---------------------------------------------------------------------------
def _shifted_dft_matrix(n):
    """Complex DFT matrix with fftshift of the output-frequency axis folded in."""
    k = np.arange(n)
    mat = np.exp(-2j * np.pi * np.outer(k, k) / n)      # mat[freq, pos]
    return np.roll(mat, n // 2, axis=0)                  # == fftshift along freq axis


def _shifted_dft2_kron(h, w):
    """Full 2-D shifted-DFT operator, real form (H*W, 2*H*W) = [Re | Im].

    M[h*W + w, kh*W + kw] = Fh_shift[kh, h] * Fw_shift[kw, w], so that for a
    row-major flattened real image x:  x @ M = [Re(fftshift(fft2(x))) | Im(...)].
    """
    fh = _shifted_dft_matrix(h)                           # (kh, h)
    fw = _shifted_dft_matrix(w)                           # (kw, w)
    m = np.kron(fh, fw).T                                 # (H*W, H*W) complex
    return np.concatenate([m.real, m.imag], axis=1).astype(np.float32)


# ---------------------------------------------------------------------------
# Fused single-matmul kernel (small H*W).
# ---------------------------------------------------------------------------
def _fft_fused_kernel(x_ref, m_ref, out_ref):
    tb, c, hw = x_ref.shape
    n = tb * c                                            # slices this grid step

    # Leading-dim merge only: layout-free.
    x2 = x_ref[...].reshape(n, hw)

    # One flat MXU matmul: K = H*W, N = 2*H*W (both lane-dense multiples of 128
    # for 16x16 inputs).
    u = jnp.dot(x2, m_ref[...], preferred_element_type=jnp.float32)  # (n, 2*hw)

    zr = u[:, :hw]                                        # vreg-aligned lane slice
    zi = u[:, hw:]

    amp = jnp.sqrt(zr * zr + zi * zi)                     # EUP
    log_amp = jnp.log(amp + 1e-10)                        # EUP (matches torch exactly)
    phase = jnp.arctan2(zi, zr)

    out_ref[:, :c, :] = log_amp.reshape(tb, c, hw)        # channels [0, C)
    out_ref[:, c:, :] = phase.reshape(tb, c, hw)          # channels [C, 2C)


def _fft_layer_fused(x):
    b, c, h, w = x.shape
    hw = h * w
    m = jnp.asarray(_shifted_dft2_kron(h, w))             # (hw, 2*hw) f32 constant

    # input block + both output planes, f32
    bytes_per_batch_row = 3 * c * hw * 4
    tb = _pick_batch_tile(b, c, bytes_per_batch_row, max_rows=256)
    grid = (b // tb,)

    # Row-major minor-dim merges: free reshapes (no copy) outside the kernel,
    # but they make every Pallas block lane-dense (last dim = H*W >= 128).
    x3 = x.reshape(b, c, hw)

    out3 = pl.pallas_call(
        _fft_fused_kernel,
        grid=grid,
        in_specs=[
            pl.BlockSpec((tb, c, hw), lambda i: (i, 0, 0)),
            pl.BlockSpec((hw, 2 * hw), lambda i: (0, 0)),   # constant block: fetched once
        ],
        out_specs=pl.BlockSpec((tb, 2 * c, hw), lambda i: (i, 0, 0)),
        out_shape=jax.ShapeDtypeStruct((b, 2 * c, hw), jnp.float32),
        compiler_params=pltpu.CompilerParams(dimension_semantics=("parallel",)),
    )(x3, m)

    return out3.reshape(b, 2 * c, h, w)


# ---------------------------------------------------------------------------
# Separable two-matmul fallback kernel (large H*W).
# ---------------------------------------------------------------------------
def _fft_separable_kernel(x_ref, fh_ref, fw_ref, out_ref):
    tb, c, h, w = x_ref.shape
    n = tb * c

    fh = fh_ref[...]                                      # (2H, H)  = [FhR ; FhI]
    fw = fw_ref[...]                                      # (W, 2W)  = [FwR^T | FwI^T]

    # Stage 1: contract over W as one flat matmul (leading-dim merge is free).
    x2d = x_ref[...].reshape(n * h, w)
    u = jnp.dot(x2d, fw, preferred_element_type=jnp.float32)      # (n*h, 2w)
    u3 = u.reshape(n, h, 2 * w)

    # Stage 2: contract over H (batched over the n slices).  At the large H/W
    # this path targets, each per-slice matmul is already MXU-sized.
    fhb = jnp.broadcast_to(fh, (n, 2 * h, h))
    t = lax.dot_general(
        fhb, u3,
        dimension_numbers=(((2,), (1,)), ((0,), (0,))),
        preferred_element_type=jnp.float32)                       # (n, 2h, 2w)

    top = t[:, :h, :]                                     # [FhR@Ur | FhR@Ui]
    bot = t[:, h:, :]                                     # [FhI@Ur | FhI@Ui]
    zr = top[:, :, :w] - bot[:, :, w:]                    # Re(FFT)
    zi = top[:, :, w:] + bot[:, :, :w]                    # Im(FFT)

    amp = jnp.sqrt(zr * zr + zi * zi)
    out_ref[:, :c, :, :] = jnp.log(amp + 1e-10).reshape(tb, c, h, w)
    out_ref[:, c:, :, :] = jnp.arctan2(zi, zr).reshape(tb, c, h, w)


def _fft_layer_separable(x):
    b, c, h, w = x.shape

    fhr, fhi = _shifted_dft_matrix(h).real, _shifted_dft_matrix(h).imag
    fwr, fwi = _shifted_dft_matrix(w).real, _shifted_dft_matrix(w).imag
    fh_stack = jnp.asarray(np.concatenate([fhr, fhi], axis=0).astype(np.float32))  # (2H, H)
    fw_cat = jnp.asarray(np.concatenate([fwr.T, fwi.T], axis=1).astype(np.float32))  # (W, 2W)

    bytes_per_batch_row = 3 * c * h * w * 4
    tb = _pick_batch_tile(b, c, bytes_per_batch_row, max_rows=32)
    grid = (b // tb,)

    return pl.pallas_call(
        _fft_separable_kernel,
        grid=grid,
        in_specs=[
            pl.BlockSpec((tb, c, h, w), lambda i: (i, 0, 0, 0)),
            pl.BlockSpec((2 * h, h), lambda i: (0, 0)),
            pl.BlockSpec((w, 2 * w), lambda i: (0, 0)),
        ],
        out_specs=pl.BlockSpec((tb, 2 * c, h, w), lambda i: (i, 0, 0, 0)),
        out_shape=jax.ShapeDtypeStruct((b, 2 * c, h, w), jnp.float32),
        compiler_params=pltpu.CompilerParams(dimension_semantics=("parallel",)),
    )(x, fh_stack, fw_cat)


# ---------------------------------------------------------------------------
# Tiling heuristic + public entry point.
# ---------------------------------------------------------------------------
def _pick_batch_tile(b, c, bytes_per_batch_row, *, max_rows=256,
                     vmem_block_budget=6 << 20):
    """Largest divisor of b keeping matmul rows / per-step block bytes modest."""
    cap_rows = max(1, max_rows // max(c, 1))
    cap_bytes = max(1, vmem_block_budget // max(bytes_per_batch_row, 1))
    cap = max(1, min(cap_rows, cap_bytes, b))
    divs = [d for d in range(1, b + 1) if b % d == 0 and d <= cap]
    tb = max(divs) if divs else 1
    # Prefer >= 2 grid steps so both v7x TensorCores get work (no-op on v5e/v6e).
    if b // tb == 1:
        smaller = [d for d in divs if b // d >= 2]
        if smaller:
            tb = max(smaller)
    return tb


def fft_layer(x, *, force_separable=False, kron_vmem_limit_bytes=8 << 20):
    """x: (B, C, H, W) float32 -> (B, 2C, H, W) float32 = [log|FFT2|+shift, angle]."""
    b, c, h, w = x.shape
    x = x.astype(jnp.float32)
    hw = h * w
    kron_bytes = 4 * hw * (2 * hw)            # f32 (H*W, 2*H*W) operator
    if (not force_separable) and kron_bytes <= kron_vmem_limit_bytes:
        return _fft_layer_fused(x)
    return _fft_layer_separable(x)


if __name__ == "__main__":
    key = jax.random.PRNGKey(0)
    B, C, H, W = 2, 4, 16, 16
    x = jax.random.normal(key, (B, C, H, W), dtype=jnp.float32)

    # Pure-JAX reference.
    ref_fft = jnp.fft.fftshift(jnp.fft.fft2(x), axes=(-2, -1))
    ref_logamp = np.asarray(jnp.log(jnp.abs(ref_fft) + 1e-10))
    ref_phase = np.asarray(jnp.angle(ref_fft))

    def check(out):
        assert out.shape == (B, 2 * C, H, W), out.shape
        got_logamp = np.asarray(out[:, :C])
        got_phase = np.asarray(out[:, C:])
        np.testing.assert_allclose(got_logamp, ref_logamp, atol=1e-3, rtol=1e-3)
        # Phase compared modulo 2*pi to be robust at the +/-pi branch cut.
        dphi = got_phase - ref_phase
        dphi = np.abs((dphi + np.pi) % (2 * np.pi) - np.pi)
        assert dphi.max() < 1e-2, dphi.max()

    out_fused = jax.block_until_ready(fft_layer(x))
    check(out_fused)

    out_sep = jax.block_until_ready(fft_layer(x, force_separable=True))
    check(out_sep)

    print("KERNEL_OK")
</pallas_src>

<mosaic_0001>
module attributes {stable_mosaic.version = 11 : i64} {
  func.func @_fft_fused_kernel(%arg0: i32, %arg1: memref<1x4x256xf32, #tpu.memory_space<vmem>>, %arg2: memref<256x512xf32, #tpu.memory_space<vmem>>, %arg3: memref<1x8x256xf32, #tpu.memory_space<vmem>>) attributes {dimension_semantics = [#tpu.dimension_semantics<parallel>], iteration_bounds = array<i64: 2>, scalar_prefetch = 0 : i64, scratch_operands = 0 : i64, tpu.core_type = #tpu.core_type<tc>, window_params = [{transform_indices = @transform_0, window_bounds = array<i64: 1, 4, 256>}, {pipeline_mode = #tpu.pipeline_mode<synchronous>, transform_indices = @transform_1, window_bounds = array<i64: 256, 512>}, {transform_indices = @transform_2, window_bounds = array<i64: 1, 8, 256>}]} {
    %c0 = arith.constant 0 : index
    %c0_0 = arith.constant 0 : index
    %c0_1 = arith.constant 0 : index
    %0 = vector.load %arg1[%c0, %c0_0, %c0_1] : memref<1x4x256xf32, #tpu.memory_space<vmem>>, vector<1x4x256xf32>
    %1 = vector.shape_cast %0 : vector<1x4x256xf32> to vector<4x256xf32>
    %c0_2 = arith.constant 0 : index
    %c0_3 = arith.constant 0 : index
    %2 = vector.load %arg2[%c0_2, %c0_3] : memref<256x512xf32, #tpu.memory_space<vmem>>, vector<256x512xf32>
    %cst = arith.constant dense<0.000000e+00> : vector<4x512xf32>
    %3 = tpu.matmul %1, %2, %cst {dimension_numbers = #tpu.dot_dimension_numbers<[1], [0], [0], [1], [0, 0, 1, 1], [], []>} : vector<4x256xf32>, vector<256x512xf32>, vector<4x512xf32> -> vector<4x512xf32>
    %4 = vector.extract_strided_slice %3 {offsets = [0, 0], sizes = [4, 256], strides = [1, 1]} : vector<4x512xf32> to vector<4x256xf32>
    %5 = vector.extract_strided_slice %3 {offsets = [0, 256], sizes = [4, 256], strides = [1, 1]} : vector<4x512xf32> to vector<4x256xf32>
    %6 = arith.mulf %4, %4 : vector<4x256xf32>
    %7 = arith.mulf %5, %5 : vector<4x256xf32>
    %8 = arith.addf %6, %7 : vector<4x256xf32>
    %9 = math.sqrt %8 : vector<4x256xf32>
    %cst_4 = arith.constant 1.000000e-10 : f32
    %10 = vector.broadcast %cst_4 : f32 to vector<4x256xf32>
    %11 = arith.addf %9, %10 : vector<4x256xf32>
    %12 = math.log %11 : vector<4x256xf32>
    %13 = math.atan2 %5, %4 : vector<4x256xf32>
    %14 = vector.shape_cast %12 : vector<4x256xf32> to vector<1x4x256xf32>
    %c0_5 = arith.constant 0 : index
    %c0_6 = arith.constant 0 : index
    %c0_7 = arith.constant 0 : index
    %15 = vector.load %arg3[%c0_5, %c0_6, %c0_7] : memref<1x8x256xf32, #tpu.memory_space<vmem>>, vector<1x4x256xf32>
    tpu.vector_store %arg3[%c0_5, %c0_6, %c0_7], %14 {strides = array<i32>} : memref<1x8x256xf32, #tpu.memory_space<vmem>>, vector<1x4x256xf32>,
    %16 = vector.shape_cast %13 : vector<4x256xf32> to vector<1x4x256xf32>
    %c0_8 = arith.constant 0 : index
    %c4 = arith.constant 4 : index
    %c0_9 = arith.constant 0 : index
    %17 = vector.load %arg3[%c0_8, %c4, %c0_9] : memref<1x8x256xf32, #tpu.memory_space<vmem>>, vector<1x4x256xf32>
    tpu.vector_store %arg3[%c0_8, %c4, %c0_9], %16 {strides = array<i32>} : memref<1x8x256xf32, #tpu.memory_space<vmem>>, vector<1x4x256xf32>,
    return
  }
  func.func @transform_0(%arg0: i32) -> (i32, i32, i32) {
    %c0_i32 = arith.constant 0 : i32
    %c0_i32_0 = arith.constant 0 : i32
    %c0_i32_1 = arith.constant 0 : i32
    return %arg0, %c0_i32, %c0_i32_0 : i32, i32, i32
  }
  func.func @transform_1(%arg0: i32) -> (i32, i32) {
    %c0_i32 = arith.constant 0 : i32
    %c0_i32_0 = arith.constant 0 : i32
    %c0_i32_1 = arith.constant 0 : i32
    return %c0_i32, %c0_i32_0 : i32, i32
  }
  func.func @transform_2(%arg0: i32) -> (i32, i32, i32) {
    %c0_i32 = arith.constant 0 : i32
    %c0_i32_0 = arith.constant 0 : i32
    %c0_i32_1 = arith.constant 0 : i32
    return %arg0, %c0_i32, %c0_i32_0 : i32, i32, i32
  }
}

</mosaic_0001>

<bundles_post_ra>
// kernel: tpu_custom_call.1
= control target key start
LH: loop header
LB: loop body
LE: loop exit
PB: predicated region body
PF: predicated region fallthrough
CT: control target
= control target key end

     0   :  { %7 = vsyncpa [#allocation3], 0  ;;  %s1349_s0 = inlined_call_operand.hbm [shape: f32[2,4,256], index: 0, kind: input, shape index: {}]   ;;  %s1350_s1 = inlined_call_operand.hbm [shape: f32[256,512], index: 1, kind: input, shape index: {}]   ;;  %s1351_s2 = inlined_call_operand.hbm [shape: f32[2,8,256], index: 2, kind: output, shape index: {}]  }
   0x1   :  { %9 = vsyncpa [#allocation3 + $0x1], 0 }
   0x2   :  { %10 = vsyncpa [#allocation6], 0 }
   0x3   :  { %11 = vsyncpa [#allocation4], 0 }
   0x4   :  { %13 = vsyncpa [#allocation4 + $0x1], 0  ;;  %s1046_s9 = smov 0   ;;  %s1048_s10 = smov 0  }
   0x5   :  { %s1050_s11 = smov 0   ;;  %s1052_s12 = smov 0  }
   0x6 LB: > { %s1067_s13 = sadd.s32 4294967295, %s1022_s12   ;;  %s674_s14 = sadd.s32 4294967294, %s1022_s12   ;;  %s1022_s12 = sphi %s1052_s12, %s1379_s12   ;;  %s1018_s11 = sphi %s1050_s11, %s1378_s11   ;;  %s1014_s10 = sphi %s1048_s10, %s1377_s10   ;;  %s1010_s9 = sphi %s1046_s9, %s1376_s9  }
   0x7   : > { %p39_p0 = scmp.ne.s32.totalorder %s1014_s10, %s1010_s9  ;;  %p1352_p1 = scmp.eq.s32.totalorder %s1067_s13, 0 }
   0x8   : > { %p90_p3 = scmp.eq.s32.totalorder %s674_s14, 1  ;;  %p675_p5 = scmp.ge.s32.totalorder %s1022_s12, 1 }
   0x9   : > { %p1076_p4 = por %p1352_p1, %p39_p0  ;;  %p97_p7 = scmp.lt.s32.totalorder %s1022_s12, 3 }
   0xa   : > { %p1081_p6 = por %p90_p3, %p39_p0  ;;  %s1024_s18 = smov [#allocation5]  }
   0xb   : > { %s1355_s15 = scalar_select %p1076_p4, 1, 0 }
   0xc   : > { %s1356_s16 = scalar_select %p1081_p6, 1, 0 }
   0xd   : > { %p1086_p8 = pnand %p675_p5, %p97_p7  ;;  %s109_s19 = sshll.u32 %s1024_s18, 4  ;;  %s1090_s19 = int_to_ptr.vmem [resolvable:$true] %s109_s19 }
   0xe   : > { %s1102_s21 = sadd.s32 1, %s1022_s12   ;;  %s26_s22 = sadd.s32 1, %s1018_s11 }
   0xf   : > { %s1357_s17 = scalar_select %p1086_p8, 1, 0 }
  0x10   : > { %p828_p9 = pneg %p1086_p8  ;;  %s23_s23 = ssub.s32 %s1022_s12, %s1102_s21 }
  0x11   : > { %s894_s26 = scalar_lea.hbm %s1350_s1, 16384 }
  0x12   : > { %p1097_p11 = pnand %p828_p9, %p1352_p1  ;;  %p895_p12 = scmp.ne.s32.totalorder %s1350_s1, %s894_s26 }
  0x13   : > { %p901_p5 = scmp.lt.u32.totalorder %s894_s26, %s1350_s1 }
  0x14   : > { %p896_p13 = pneg %p1097_p11 }
  0x16   : > { %p897_p0 = pnand %p896_p13, %p895_p12 }
  0x18   : > { %p898_p3 = pneg %p897_p0 }
  0x1a   : > { %p903_p7 = pnand %p901_p5, %p898_p3 }
  0x1c   : > { %906 = shalt.err (!%p903_p7)
}
  0x1d   : > { %s907_s3 = scalar_lea.vmem %s1090_s19, 16384  ;;  %p915_p2 = scmp.lt.s32.totalorder %s1090_s19, %s1090_s19 }
  0x1e   : > { %p908_p9 = scmp.ne.s32.totalorder %s1090_s19, %s907_s3  ;;  %p916_p6 = scmp.lt.s32.totalorder %s907_s3, %s907_s3 }
  0x20   : > { %p910_p10 = pnand %p908_p9, %p896_p13  ;;  %p917_p4 = por %p916_p6, %p915_p2 }
  0x22   : > { %p911_p1 = pneg %p910_p10 }
  0x24   : > { %p918_p8 = pnand %p917_p4, %p911_p1 }
  0x26   : > { %921 = shalt.err (!%p918_p8)
}
  0x27   : > { %s1025_s4 = smov 512   ;;  %s1026_s5 = smov 32  }
  0x28   : > { %831 = dma.hbm_to_vmem [thread:$0]  (!%p1097_p11), %s1350_s1, 16384, %s1090_s19, [#allocation6], %s1025_s4, %s1025_s4, %s1026_s5  }
  0x29   : > { %p24_p2 = scmp.eq.s32.totalorder %s23_s23, 0  ;;  %p33_p1 = scmp.ne.s32.totalorder %s1018_s11, %s1014_s10 }
  0x2a   : > { %p34_p4 = scmp.eq.s32.totalorder %s1022_s12, 0  ;;  %p841_p6 = scmp.lt.s32.totalorder %s1022_s12, 2 }
  0x2b   : > { %s1133_s8 = scalar_select %p24_p2, %s1018_s11, %s26_s22  }
  0x2c   : > { %p35_p8 = por %p34_p4, %p33_p1  ;;  %p1359_p10 = scmp.eq.s32.totalorder %s1067_s13, 1 }
  0x2d   : > { %s123_s18 = sand.u32 1, %s1018_s11   ;;  %s690_s24 = sshll.u32 %s1022_s12, 7 }
  0x2e   : > { %p1137_p12 = por %p1359_p10, %p33_p1  ;;  %s678_s25 = sshll.u32 %s123_s18, 3 }
  0x2f   : > { %s1146_s27 = scalar_lea.hbm %s1349_s0, %s690_s24  ;;  %s127_s19 = scalar_lea.vmem [#allocation2], %s678_s25 }
  0x30   : > { %s135_s22 = sshll.u32 %s127_s19, 4  ;;  %p1148_p11 = pnand %p841_p6, %p35_p8  ;;  %s1152_s22 = int_to_ptr.vmem [resolvable:$true] %s135_s22 }
  0x31   : > { %s124_s28 = scalar_lea.sflag [#allocation3], %s123_s18  ;;  %s922_s29 = scalar_lea.hbm %s1146_s27, 128 }
  0x32   : > { %p923_p13 = scmp.ne.s32.totalorder %s1146_s27, %s922_s29  ;;  %p924_p0 = pneg %p1148_p11 }
  0x33   : > { %s927_s4 = scalar_lea.hbm %s1349_s0, 256  ;;  %p928_p7 = scmp.lt.u32.totalorder %s1146_s27, %s1349_s0 }
  0x34   : > { %p925_p3 = pnand %p924_p0, %p923_p13  ;;  %p929_p9 = scmp.lt.u32.totalorder %s927_s4, %s922_s29 }
  0x35   : > { %p931_p1 = scmp.lt.u32.totalorder %s922_s29, %s1146_s27 }
  0x36   : > { %p926_p5 = pneg %p925_p3  ;;  %p930_p2 = por %p929_p9, %p928_p7 }
  0x38   : > { %p932_p4 = por %p931_p1, %p930_p2 }
  0x3a   : > { %p933_p6 = pnand %p932_p4, %p926_p5 }
  0x3c   : > { %936 = shalt.err (!%p933_p6)
}
  0x3d   : > { %s937_s7 = scalar_lea.vmem %s1152_s22, 128  ;;  %s1027_s18 = smov [#allocation2]  }
  0x3e   : > { %p938_p8 = scmp.ne.s32.totalorder %s1152_s22, %s937_s7  ;;  %s942_s24 = sshll.u32 %s1027_s18, 4  ;;  %s943_s24 = int_to_ptr.vmem [resolvable:$false] %s942_s24 }
  0x3f   : > { %s944_s25 = scalar_lea.vmem %s943_s24, 256  ;;  %p945_p3 = scmp.lt.s32.totalorder %s1152_s22, %s943_s24 }
  0x40   : > { %p940_p10 = pnand %p938_p8, %p924_p0  ;;  %p946_p7 = scmp.lt.s32.totalorder %s944_s25, %s937_s7 }
  0x42   : > { %p941_p13 = pneg %p940_p10  ;;  %p947_p9 = por %p946_p7, %p945_p3 }
  0x44   : > { %p948_p2 = pnand %p947_p9, %p941_p13 }
  0x46   : > { %951 = shalt.err (!%p948_p2)
}
  0x47   : > { %835 = dma.hbm_to_vmem [thread:$0]  (!%p1148_p11), %s1146_s27, 128, %s1152_s22, %s124_s28  }
  0x48   : > { %p1362_p5 = scmp.ne.s32.totalorder %s1357_s17, 0 }
  0x49   : > { %s1182_s20 = sand.u32 (!%p1362_p5), 1, %s1014_s10   ;;  %p1363_p0 = scmp.ne.s32.totalorder (!%p1362_p5), %s1355_s15, 0 }
  0x4a   : > { %144 = sbr.rel (%p1362_p5) target bundleno = 451 (0x1c3), region = 28  ;;  %s682_s26 = sshll.u32 (!%p1362_p5), %s1182_s20, 3 }
  0x4b   : > { %s147_s19 = scalar_lea.sflag (!%p1362_p5), [#allocation3], %s1182_s20  ;;  %s1186_s29 = scalar_lea.vmem (!%p1362_p5), [#allocation2], %s682_s26 }
  0x51   : > { %997 = dma.done.wait (%p1363_p0), %s147_s19, 128  }
  0x52   : > { %999 = vsyncadd (%p1363_p0), %s147_s19, 4294967168  ;;  %p1364_p11 = scmp.eq.s32.totalorder %s1067_s13, 0 }
  0x54   : > { %1001 = dma.done.wait (%p1364_p11), [#allocation6], 16384   ;;  %p1365_p1 = pmov %p1364_p11 }
  0x55   : > { %v177_v0 = vld [vmem:[#allocation5 + $0x8] sm:$0xff]  ;;  %v179_v2 = vld [vmem:[#allocation5 + $0x18] sm:$0xff]  ;;  %v176_v5 = vld [vmem:[#allocation5] sm:$0xff]  ;;  %s684_s15 = sshll.u32 %s1182_s20, 4  ;;  %s691_s27 = sshll.u32 %s1067_s13, 8 }
  0x56   : > { %1003 = vsyncadd (%p1365_p1), [#allocation6], 4294950912  ;;  %v181_v1 = vld [vmem:[#allocation5 + $0x28] sm:$0xff]  ;;  %v183_v4 = vld [vmem:[#allocation5 + $0x38] sm:$0xff]  ;;  %s1272_s17 = scalar_lea.vmem [#allocation7], %s684_s15  ;;  %s1304_s30 = scalar_lea.hbm %s1351_s2, %s691_s27 }
  0x57   : > { %v692_v3 = vpack.c.bf16 %v181_v1, %v177_v0  ;;  %v180_v6 = vld [vmem:[#allocation5 + $0x20] sm:$0xff]  ;;  %v756_v7 = vpack.c.bf16 %v183_v4, %v179_v2  ;;  %v178_v9 = vld [vmem:[#allocation5 + $0x10] sm:$0xff]  ;;  %v185_v11 = vld [vmem:[#allocation5 + $0x48] sm:$0xff]  ;;  %s594_s22 = sshll.u32 %s1272_s17, 4  ;;  %s580_s3 = scalar_lea.sflag [#allocation4], %s1182_s20  ;;  %s1306_s22 = int_to_ptr.vmem [resolvable:$true] %s594_s22 }
  0x58   : > { %v694_v8 = vpack.c.bf16 %v180_v6, %v176_v5  ;;  %v182_v10 = vld [vmem:[#allocation5 + $0x30] sm:$0xff]  ;;  %v189_v13 = vld [vmem:[#allocation5 + $0x68] sm:$0xff]  ;;  %v187_v14 = vld [vmem:[#allocation5 + $0x58] sm:$0xff]  ;;  %s952_s4 = scalar_lea.vmem %s1306_s22, 256  ;;  %s1030_s13 = smov [#allocation7]  }
  0x59   : > { %693 = vmatprep.subr.bf16.mxu0 %v692_v3  ;;  %v758_v12 = vpack.c.bf16 %v182_v10, %v178_v9  ;;  %v191_v15 = vld [vmem:[#allocation5 + $0x78] sm:$0xff]  ;;  %757 = vmatprep.subr.bf16.mxu1 %v756_v7  ;;  %v696_v16 = vpack.c.bf16 %v189_v13, %v185_v11  ;;  %v184_v18 = vld [vmem:[#allocation5 + $0x40] sm:$0xff]  ;;  %v186_v20 = vld [vmem:[#allocation5 + $0x50] sm:$0xff]  ;;  %p953_p4 = scmp.ne.s32.totalorder %s1306_s22, %s952_s4  ;;  %s956_s5 = sshll.u32 %s1030_s13, 4  ;;  %s957_s5 = int_to_ptr.vmem [resolvable:$false] %s956_s5 }
  0x5a   : > { %695 = vmatpush1.bf16.msra.mxu0 %v694_v8  ;;  %v760_v17 = vpack.c.bf16 %v191_v15, %v187_v14  ;;  %v188_v19 = vld [vmem:[#allocation5 + $0x60] sm:$0xff]  ;;  %v190_v22 = vld [vmem:[#allocation5 + $0x70] sm:$0xff]  ;;  %v193_v23 = vld [vmem:[#allocation5 + $0x88] sm:$0xff]  ;;  %s958_s6 = scalar_lea.vmem %s957_s5, 512  ;;  %p959_p10 = scmp.lt.s32.totalorder %s1306_s22, %s957_s5 }
  0x5b   : > { %759 = vmatpush1.bf16.msra.mxu1 %v758_v12  ;;  %v698_v21 = vpack.c.bf16 %v188_v19, %v184_v18  ;;  %v197_v24 = vld [vmem:[#allocation5 + $0xa8] sm:$0xff]  ;;  %697 = vmatprep.subr.bf16.mxu0 %v696_v16  ;;  %v762_v25 = vpack.c.bf16 %v190_v22, %v186_v20  ;;  %v195_v27 = vld [vmem:[#allocation5 + $0x98] sm:$0xff]  ;;  %v192_v29 = vld [vmem:[#allocation5 + $0x80] sm:$0xff]  ;;  %p954_p6 = pnand %p953_p4, %p1137_p12  ;;  %p960_p13 = scmp.lt.s32.totalorder %s958_s6, %s952_s4 }
  0x5c   : > { %761 = vmatprep.subr.bf16.mxu1 %v760_v17  ;;  %v700_v26 = vpack.c.bf16 %v197_v24, %v193_v23  ;;  %v199_v28 = vld [vmem:[#allocation5 + $0xb8] sm:$0xff]  ;;  %v196_v31 = vld [vmem:[#allocation5 + $0xa0] sm:$0xff]  ;;  %v194_v32 = vld [vmem:[#allocation5 + $0x90] sm:$0xff] }
  0x5d   : > { %v764_v30 = vpack.c.bf16 %v199_v28, %v195_v27  ;;  %v198_v33 = vld [vmem:[#allocation5 + $0xb0] sm:$0xff]  ;;  %v702_v34 = vpack.c.bf16 %v196_v31, %v192_v29  ;;  %v201_v35 = vld [vmem:[#allocation5 + $0xc8] sm:$0xff]  ;;  %v203_v37 = vld [vmem:[#allocation5 + $0xd8] sm:$0xff]  ;;  %p955_p8 = pneg %p954_p6  ;;  %p961_p3 = por %p960_p13, %p959_p10 }
  0x5e   : > { %699 = vmatpush1.bf16.msra.mxu0 %v698_v21  ;;  %v205_v36 = vld [vmem:[#allocation5 + $0xe8] sm:$0xff]  ;;  %v766_v38 = vpack.c.bf16 %v198_v33, %v194_v32  ;;  %v207_v40 = vld [vmem:[#allocation5 + $0xf8] sm:$0xff]  ;;  %v200_v41 = vld [vmem:[#allocation5 + $0xc0] sm:$0xff] }
  0x5f   : > { %763 = vmatpush1.bf16.msra.mxu1 %v762_v25  ;;  %701 = vmatprep.subr.bf16.mxu0 %v700_v26  ;;  %v704_v39 = vpack.c.bf16 %v205_v36, %v201_v35  ;;  %v204_v42 = vld [vmem:[#allocation5 + $0xe0] sm:$0xff]  ;;  %v768_v43 = vpack.c.bf16 %v207_v40, %v203_v37  ;;  %v202_v44 = vld [vmem:[#allocation5 + $0xd0] sm:$0xff]  ;;  %v209_v46 = vld [vmem:[#allocation5 + $0x108] sm:$0xff]  ;;  %p962_p7 = pnand %p961_p3, %p955_p8 }
  0x60   : > { %765 = vmatprep.subr.bf16.mxu1 %v764_v30  ;;  %v206_v45 = vld [vmem:[#allocation5 + $0xf0] sm:$0xff]  ;;  %v213_v47 = vld [vmem:[#allocation5 + $0x128] sm:$0xff]  ;;  %v211_v48 = vld [vmem:[#allocation5 + $0x118] sm:$0xff]  ;;  %v706_v50 = vpack.c.bf16 %v204_v42, %v200_v41 }
  0x61   : > { %v215_v49 = vld [vmem:[#allocation5 + $0x138] sm:$0xff]  ;;  %v770_v51 = vpack.c.bf16 %v206_v45, %v202_v44  ;;  %v708_v52 = vpack.c.bf16 %v213_v47, %v209_v46  ;;  %v208_v53 = vld [vmem:[#allocation5 + $0x100] sm:$0xff]  ;;  %v210_v55 = vld [vmem:[#allocation5 + $0x110] sm:$0xff] }
  0x62   : > { %703 = vmatpush1.bf16.msra.mxu0 %v702_v34  ;;  %v212_v54 = vld [vmem:[#allocation5 + $0x120] sm:$0xff]  ;;  %v772_v56 = vpack.c.bf16 %v215_v49, %v211_v48  ;;  %v214_v57 = vld [vmem:[#allocation5 + $0x130] sm:$0xff]  ;;  %v217_v58 = vld [vmem:[#allocation5 + $0x148] sm:$0xff] }
  0x63   : > { %767 = vmatpush1.bf16.msra.mxu1 %v766_v38  ;;  %705 = vmatprep.subr.bf16.mxu0 %v704_v39  ;;  %v221_v59 = vld [vmem:[#allocation5 + $0x168] sm:$0xff]  ;;  %v219_v60 = vld [vmem:[#allocation5 + $0x158] sm:$0xff]  ;;  %v710_v62 = vpack.c.bf16 %v212_v54, %v208_v53  ;;  %v774_v63 = vpack.c.bf16 %v214_v57, %v210_v55  ;;  %v216_v1 = vld [vmem:[#allocation5 + $0x140] sm:$0xff] }
  0x64   : > { %769 = vmatprep.subr.bf16.mxu1 %v768_v43  ;;  %v223_v61 = vld [vmem:[#allocation5 + $0x178] sm:$0xff]  ;;  %v712_v0 = vpack.c.bf16 %v221_v59, %v217_v58  ;;  %v220_v2 = vld [vmem:[#allocation5 + $0x160] sm:$0xff]  ;;  %v218_v3 = vld [vmem:[#allocation5 + $0x150] sm:$0xff] }
  0x65   : > { %v776_v4 = vpack.c.bf16 %v223_v61, %v219_v60  ;;  %v222_v5 = vld [vmem:[#allocation5 + $0x170] sm:$0xff]  ;;  %v225_v6 = vld [vmem:[#allocation5 + $0x188] sm:$0xff]  ;;  %v227_v8 = vld [vmem:[#allocation5 + $0x198] sm:$0xff]  ;;  %v714_v10 = vpack.c.bf16 %v220_v2, %v216_v1 }
  0x66   : > { %707 = vmatpush1.bf16.msra.mxu0 %v706_v50  ;;  %v229_v7 = vld [vmem:[#allocation5 + $0x1a8] sm:$0xff]  ;;  %v231_v9 = vld [vmem:[#allocation5 + $0x1b8] sm:$0xff]  ;;  %v778_v11 = vpack.c.bf16 %v222_v5, %v218_v3  ;;  %v224_v13 = vld [vmem:[#allocation5 + $0x180] sm:$0xff] }
  0x67   : > { %771 = vmatpush1.bf16.msra.mxu1 %v770_v51  ;;  %709 = vmatprep.subr.bf16.mxu0 %v708_v52  ;;  %v716_v12 = vpack.c.bf16 %v229_v7, %v225_v6  ;;  %v228_v14 = vld [vmem:[#allocation5 + $0x1a0] sm:$0xff]  ;;  %v226_v15 = vld [vmem:[#allocation5 + $0x190] sm:$0xff]  ;;  %v780_v16 = vpack.c.bf16 %v231_v9, %v227_v8  ;;  %v233_v18 = vld [vmem:[#allocation5 + $0x1c8] sm:$0xff] }
  0x68   : > { %773 = vmatprep.subr.bf16.mxu1 %v772_v56  ;;  %v230_v17 = vld [vmem:[#allocation5 + $0x1b0] sm:$0xff]  ;;  %v237_v19 = vld [vmem:[#allocation5 + $0x1e8] sm:$0xff]  ;;  %v235_v20 = vld [vmem:[#allocation5 + $0x1d8] sm:$0xff]  ;;  %v718_v22 = vpack.c.bf16 %v228_v14, %v224_v13 }
  0x69   : > { %v239_v21 = vld [vmem:[#allocation5 + $0x1f8] sm:$0xff]  ;;  %v782_v23 = vpack.c.bf16 %v230_v17, %v226_v15  ;;  %v720_v24 = vpack.c.bf16 %v237_v19, %v233_v18  ;;  %v232_v25 = vld [vmem:[#allocation5 + $0x1c0] sm:$0xff]  ;;  %v234_v27 = vld [vmem:[#allocation5 + $0x1d0] sm:$0xff] }
  0x6a   : > { %711 = vmatpush1.bf16.msra.mxu0 %v710_v62  ;;  %v236_v26 = vld [vmem:[#allocation5 + $0x1e0] sm:$0xff]  ;;  %v784_v28 = vpack.c.bf16 %v239_v21, %v235_v20  ;;  %v238_v29 = vld [vmem:[#allocation5 + $0x1f0] sm:$0xff]  ;;  %v241_v30 = vld [vmem:[#allocation5 + $0x208] sm:$0xff] }
  0x6b   : > { %775 = vmatpush1.bf16.msra.mxu1 %v774_v63  ;;  %713 = vmatprep.subr.bf16.mxu0 %v712_v0  ;;  %v245_v31 = vld [vmem:[#allocation5 + $0x228] sm:$0xff]  ;;  %v243_v32 = vld [vmem:[#allocation5 + $0x218] sm:$0xff]  ;;  %v722_v34 = vpack.c.bf16 %v236_v26, %v232_v25  ;;  %v786_v35 = vpack.c.bf16 %v238_v29, %v234_v27  ;;  %v240_v37 = vld [vmem:[#allocation5 + $0x200] sm:$0xff] }
  0x6c   : > { %777 = vmatprep.subr.bf16.mxu1 %v776_v4  ;;  %v247_v33 = vld [vmem:[#allocation5 + $0x238] sm:$0xff]  ;;  %v724_v36 = vpack.c.bf16 %v245_v31, %v241_v30  ;;  %v244_v38 = vld [vmem:[#allocation5 + $0x220] sm:$0xff]  ;;  %v242_v39 = vld [vmem:[#allocation5 + $0x210] sm:$0xff] }
  0x6d   : > { %v788_v40 = vpack.c.bf16 %v247_v33, %v243_v32  ;;  %v246_v41 = vld [vmem:[#allocation5 + $0x230] sm:$0xff]  ;;  %v249_v42 = vld [vmem:[#allocation5 + $0x248] sm:$0xff]  ;;  %v251_v44 = vld [vmem:[#allocation5 + $0x258] sm:$0xff]  ;;  %v726_v46 = vpack.c.bf16 %v244_v38, %v240_v37 }
  0x6e   : > { %715 = vmatpush1.bf16.msra.mxu0 %v714_v10  ;;  %v253_v43 = vld [vmem:[#allocation5 + $0x268] sm:$0xff]  ;;  %v255_v45 = vld [vmem:[#allocation5 + $0x278] sm:$0xff]  ;;  %v790_v47 = vpack.c.bf16 %v246_v41, %v242_v39  ;;  %v248_v49 = vld [vmem:[#allocation5 + $0x240] sm:$0xff] }
  0x6f   : > { %779 = vmatpush1.bf16.msra.mxu1 %v778_v11  ;;  %717 = vmatprep.subr.bf16.mxu0 %v716_v12  ;;  %v728_v48 = vpack.c.bf16 %v253_v43, %v249_v42  ;;  %v252_v50 = vld [vmem:[#allocation5 + $0x260] sm:$0xff]  ;;  %v250_v51 = vld [vmem:[#allocation5 + $0x250] sm:$0xff]  ;;  %v792_v52 = vpack.c.bf16 %v255_v45, %v251_v44  ;;  %v257_v54 = vld [vmem:[#allocation5 + $0x288] sm:$0xff] }
  0x70   : > { %781 = vmatprep.subr.bf16.mxu1 %v780_v16  ;;  %v254_v53 = vld [vmem:[#allocation5 + $0x270] sm:$0xff]  ;;  %v261_v55 = vld [vmem:[#allocation5 + $0x2a8] sm:$0xff]  ;;  %v259_v56 = vld [vmem:[#allocation5 + $0x298] sm:$0xff]  ;;  %v730_v58 = vpack.c.bf16 %v252_v50, %v248_v49 }
  0x71   : > { %v263_v57 = vld [vmem:[#allocation5 + $0x2b8] sm:$0xff]  ;;  %v794_v59 = vpack.c.bf16 %v254_v53, %v250_v51  ;;  %v732_v60 = vpack.c.bf16 %v261_v55, %v257_v54  ;;  %v256_v61 = vld [vmem:[#allocation5 + $0x280] sm:$0xff]  ;;  %v258_v63 = vld [vmem:[#allocation5 + $0x290] sm:$0xff] }
  0x72   : > { %719 = vmatpush1.bf16.msra.mxu0 %v718_v22  ;;  %v260_v62 = vld [vmem:[#allocation5 + $0x2a0] sm:$0xff]  ;;  %v796_v0 = vpack.c.bf16 %v263_v57, %v259_v56  ;;  %v262_v1 = vld [vmem:[#allocation5 + $0x2b0] sm:$0xff]  ;;  %v265_v2 = vld [vmem:[#allocation5 + $0x2c8] sm:$0xff] }
  0x73   : > { %783 = vmatpush1.bf16.msra.mxu1 %v782_v23  ;;  %721 = vmatprep.subr.bf16.mxu0 %v720_v24  ;;  %v269_v3 = vld [vmem:[#allocation5 + $0x2e8] sm:$0xff]  ;;  %v267_v4 = vld [vmem:[#allocation5 + $0x2d8] sm:$0xff]  ;;  %v734_v6 = vpack.c.bf16 %v260_v62, %v256_v61  ;;  %v264_v7 = vld [vmem:[#allocation5 + $0x2c0] sm:$0xff]  ;;  %v798_v8 = vpack.c.bf16 %v262_v1, %v258_v63 }
  0x74   : > { %785 = vmatprep.subr.bf16.mxu1 %v784_v28  ;;  %v271_v5 = vld [vmem:[#allocation5 + $0x2f8] sm:$0xff]  ;;  %v736_v9 = vpack.c.bf16 %v269_v3, %v265_v2  ;;  %v268_v10 = vld [vmem:[#allocation5 + $0x2e0] sm:$0xff]  ;;  %v266_v11 = vld [vmem:[#allocation5 + $0x2d0] sm:$0xff] }
  0x75   : > { %v270_v12 = vld [vmem:[#allocation5 + $0x2f0] sm:$0xff]  ;;  %v800_v13 = vpack.c.bf16 %v271_v5, %v267_v4  ;;  %v273_v14 = vld [vmem:[#allocation5 + $0x308] sm:$0xff]  ;;  %v275_v17 = vld [vmem:[#allocation5 + $0x318] sm:$0xff]  ;;  %v738_v20 = vpack.c.bf16 %v268_v10, %v264_v7 }
  0x76   : > { %723 = vmatpush1.bf16.msra.mxu0 %v722_v34  ;;  %v277_v15 = vld [vmem:[#allocation5 + $0x328] sm:$0xff]  ;;  %v1197_v16 = vld [vmem:[%s1186_s29] sm:$0xff]  ;;  %v802_v21 = vpack.c.bf16 %v270_v12, %v266_v11  ;;  %v272_v23 = vld [vmem:[#allocation5 + $0x300] sm:$0xff] }
  0x77   : > { %787 = vmatpush1.bf16.msra.mxu1 %v786_v35  ;;  %725 = vmatprep.subr.bf16.mxu0 %v724_v36  ;;  %v279_v18 = vld [vmem:[#allocation5 + $0x338] sm:$0xff]  ;;  %v305_v19 = vcombine.high %v1197_v16, %v1197_v16  ;;  %v740_v22 = vpack.c.bf16 %v277_v15, %v273_v14  ;;  %v276_v24 = vld [vmem:[#allocation5 + $0x320] sm:$0xff]  ;;  %v274_v25 = vld [vmem:[#allocation5 + $0x310] sm:$0xff] }
  0x78   : > { %789 = vmatprep.subr.bf16.mxu1 %v788_v40  ;;  %v804_v26 = vpack.c.bf16 %v279_v18, %v275_v17  ;;  %v278_v27 = vld [vmem:[#allocation5 + $0x330] sm:$0xff]  ;;  %v281_v28 = vld [vmem:[#allocation5 + $0x348] sm:$0xff]  ;;  %v283_v30 = vld [vmem:[#allocation5 + $0x358] sm:$0xff]  ;;  %v742_v32 = vpack.c.bf16 %v276_v24, %v272_v23 }
  0x79   : > { %v285_v29 = vld [vmem:[#allocation5 + $0x368] sm:$0xff]  ;;  %371 = vmatprep.mubr.f32.mxu0 %v305_v19  ;;  %v287_v31 = vld [vmem:[#allocation5 + $0x378] sm:$0xff]  ;;  %442 = vmatprep.mubr.f32.mxu1 %v305_v19  ;;  %v806_v33 = vpack.c.bf16 %v278_v27, %v274_v25  ;;  %v280_v35 = vld [vmem:[#allocation5 + $0x340] sm:$0xff] }
  0x7a   : > { %727 = vmatpush1.bf16.msra.mxu0 %v726_v46  ;;  %v744_v34 = vpack.c.bf16 %v285_v29, %v281_v28  ;;  %v284_v36 = vld [vmem:[#allocation5 + $0x360] sm:$0xff]  ;;  %v282_v37 = vld [vmem:[#allocation5 + $0x350] sm:$0xff]  ;;  %v808_v38 = vpack.c.bf16 %v287_v31, %v283_v30  ;;  %v289_v40 = vld [vmem:[#allocation5 + $0x388] sm:$0xff] }
  0x7b   : > { %791 = vmatpush1.bf16.msra.mxu1 %v790_v47  ;;  %729 = vmatprep.subr.bf16.mxu0 %v728_v48  ;;  %v286_v39 = vld [vmem:[#allocation5 + $0x370] sm:$0xff]  ;;  %v293_v41 = vld [vmem:[#allocation5 + $0x3a8] sm:$0xff]  ;;  %v291_v42 = vld [vmem:[#allocation5 + $0x398] sm:$0xff]  ;;  %v746_v44 = vpack.c.bf16 %v284_v36, %v280_v35 }
  0x7c   : > { %793 = vmatprep.subr.bf16.mxu1 %v792_v52  ;;  %v295_v43 = vld [vmem:[#allocation5 + $0x3b8] sm:$0xff]  ;;  %v810_v45 = vpack.c.bf16 %v286_v39, %v282_v37  ;;  %v748_v46 = vpack.c.bf16 %v293_v41, %v289_v40  ;;  %v288_v47 = vld [vmem:[#allocation5 + $0x380] sm:$0xff]  ;;  %v290_v49 = vld [vmem:[#allocation5 + $0x390] sm:$0xff] }
  0x7d   : > { %v292_v48 = vld [vmem:[#allocation5 + $0x3a0] sm:$0xff]  ;;  %v812_v50 = vpack.c.bf16 %v295_v43, %v291_v42  ;;  %v294_v51 = vld [vmem:[#allocation5 + $0x3b0] sm:$0xff]  ;;  %v297_v52 = vld [vmem:[#allocation5 + $0x3c8] sm:$0xff] }
  0x7e   : > { %731 = vmatpush1.bf16.msra.mxu0 %v730_v58  ;;  %v301_v53 = vld [vmem:[#allocation5 + $0x3e8] sm:$0xff]  ;;  %v299_v54 = vld [vmem:[#allocation5 + $0x3d8] sm:$0xff]  ;;  %v750_v56 = vpack.c.bf16 %v292_v48, %v288_v47  ;;  %v814_v57 = vpack.c.bf16 %v294_v51, %v290_v49  ;;  %v298_v62 = vld [vmem:[#allocation5 + $0x3d0] sm:$0xff] }
  0x7f   : > { %795 = vmatpush1.bf16.msra.mxu1 %v794_v59  ;;  %733 = vmatprep.subr.bf16.mxu0 %v732_v60  ;;  %v303_v55 = vld [vmem:[#allocation5 + $0x3f8] sm:$0xff]  ;;  %v752_v58 = vpack.c.bf16 %v301_v53, %v297_v52  ;;  %v296_v59 = vld [vmem:[#allocation5 + $0x3c0] sm:$0xff]  ;;  %v302_v63 = vld [vmem:[#allocation5 + $0x3f0] sm:$0xff] }
  0x80   : > { %797 = vmatprep.subr.bf16.mxu1 %v796_v0  ;;  %v300_v60 = vld [vmem:[#allocation5 + $0x3e0] sm:$0xff]  ;;  %v816_v61 = vpack.c.bf16 %v303_v55, %v299_v54  ;;  %v818_v1 = vpack.c.bf16 %v302_v63, %v298_v62 }
  0x81   : > { %v754_v0 = vpack.c.bf16 %v300_v60, %v296_v59 }
  0x82   : > { %735 = vmatpush1.bf16.msra.mxu0 %v734_v6 }
  0x83   : > { %799 = vmatpush1.bf16.msra.mxu1 %v798_v8  ;;  %737 = vmatprep.subr.bf16.mxu0 %v736_v9 }
  0x84   : > { %801 = vmatprep.subr.bf16.mxu1 %v800_v13 }
  0x86   : > { %739 = vmatpush1.bf16.msra.mxu0 %v738_v20 }
  0x87   : > { %803 = vmatpush1.bf16.msra.mxu1 %v802_v21  ;;  %741 = vmatprep.subr.bf16.mxu0 %v740_v22 }
  0x88   : > { %805 = vmatprep.subr.bf16.mxu1 %v804_v26 }
  0x8a   : > { %743 = vmatpush1.bf16.msra.mxu0 %v742_v32 }
  0x8b   : > { %807 = vmatpush1.bf16.msra.mxu1 %v806_v33  ;;  %745 = vmatprep.subr.bf16.mxu0 %v744_v34 }
  0x8c   : > { %809 = vmatprep.subr.bf16.mxu1 %v808_v38 }
  0x8e   : > { %747 = vmatpush1.bf16.msra.mxu0 %v746_v44 }
  0x8f   : > { %811 = vmatpush1.bf16.msra.mxu1 %v810_v45  ;;  %749 = vmatprep.subr.bf16.mxu0 %v748_v46 }
  0x90   : > { %813 = vmatprep.subr.bf16.mxu1 %v812_v50 }
  0x92   : > { %751 = vmatpush1.bf16.msra.mxu0 %v750_v56 }
  0x93   : > { %815 = vmatpush1.bf16.msra.mxu1 %v814_v57  ;;  %753 = vmatprep.subr.bf16.mxu0 %v752_v58 }
  0x94   : > { %817 = vmatprep.subr.bf16.mxu1 %v816_v61 }
  0x96   : > { %755 = vmatpush1.bf16.msra.mxu0 %v754_v0 }
  0x97   : > { %819 = vmatpush1.bf16.msra.mxu1 %v818_v1 }
  0x99   : > { %372 = vmatmul.mubr.f32.vlgmr.msra.gmra.mrb[0].mxu0 %v1197_v16 }
  0x9a   : > { %443 = vmatmul.mubr.f32.vlgmr.msra.gmra.mrb[0].mxu1 %v1197_v16 }
 0x16c   : > { %v1203_v2 = vpop.f32.mrb[0].mxu0 }
 0x16d   : > { %v449_v3 = vmul.f32 %v1203_v2, %v1203_v2  ;;  %v1208_v4 = vand.u32 2147483647, %v1203_v2  ;;  %v1210_v5 = vpop.f32.mrb[0].mxu1  ;;  %v1212_v6 = vpop.f32.mrb[1].mxu0  ;;  %vm509_vm0 = vcmp.ne.f32.partialorder %v1203_v2, %v1203_v2 }
 0x16e   : > { %v451_v7 = vmul.f32 %v1210_v5, %v1210_v5  ;;  %v1219_v8 = vand.u32 2147483647, %v1210_v5  ;;  %v1221_v9 = vpop.f32.mrb[1].mxu1  ;;  %vm510_vm1 = vcmp.ne.f32.partialorder %v1210_v5, %v1210_v5  ;;  %v450_v14 = vmul.f32 %v1212_v6, %v1212_v6 }
 0x16f   : > { %vm1231_vm3 = vmor %vm509_vm0, %vm510_vm1  ;;  %vm515_vm4 = vcmp.eq.s32.totalorder %v1208_v4, inf  ;;  %v1240_v15 = vand.u32 2147483647, %v1212_v6  ;;  %vm556_vm7 = vcmp.ne.f32.partialorder %v1212_v6, %v1212_v6  ;;  %v452_v17 = vmul.f32 %v1221_v9, %v1221_v9 }
 0x170   : > { %v453_v10 = vadd.f32 %v451_v7, %v449_v3  ;;  %v477_v11 = vmin.f32 %v1208_v4, %v1219_v8  ;;  %v478_v12 = vmax.f32 %v1208_v4, %v1219_v8  ;;  %vm499_vm2 = vcmp.gt.f32.partialorder %v1219_v8, %v1208_v4 }
 0x171   : > { %vm516_vm5 = vcmp.eq.s32.totalorder %v1219_v8, inf  ;;  %v1251_v18 = vand.u32 2147483647, %v1221_v9  ;;  %vm557_vm8 = vcmp.ne.f32.partialorder %v1221_v9, %v1221_v9  ;;  %vm562_vm9 = vcmp.eq.s32.totalorder %v1240_v15, inf }
 0x172   : > { %882 = vrsqrt.f32 %v453_v10  ;;  %vm1242_vm6 = vmand %vm515_vm4, %vm516_vm5  ;;  %v454_v19 = vadd.f32 %v452_v17, %v450_v14  ;;  %vm457_vm14 = vcmp.eq.f32.partialorder %v453_v10, inf  ;;  %v460_v28 = vand.u32 2147483648, %v453_v10 }
 0x173   : > { %884 = vrcp.f32 %v478_v12  ;;  %vm1256_vm10 = vmor %vm556_vm7, %vm557_vm8  ;;  %v524_v21 = vmin.f32 %v1240_v15, %v1251_v18  ;;  %v525_v22 = vmax.f32 %v1240_v15, %v1251_v18  ;;  %vm546_vm11 = vcmp.gt.f32.partialorder %v1251_v18, %v1240_v15 }
 0x174   : > { %vm563_vm12 = vcmp.eq.s32.totalorder %v1251_v18, inf  ;;  %886 = vrsqrt.f32 %v454_v19  ;;  %vm459_vm15 = vcmp.eq.f32.partialorder %v453_v10, 0.0  ;;  %vm464_vm0 = vcmp.eq.f32.partialorder %v454_v19, inf }
 0x175   : > { %vm1267_vm13 = vmand %vm562_vm9, %vm563_vm12  ;;  %888 = vrcp.f32 %v525_v22  ;;  %v467_v37 = vand.u32 2147483648, %v454_v19  ;;  %vm466_vm1 = vcmp.eq.f32.partialorder %v454_v19, 0.0  ;;  %vm505_vm4 = vcmp.lt.s32.totalorder %v1203_v2, 0 }
 0x176   : > { %vm502_vm5 = vcmp.lt.f32.partialorder %v1203_v2, 0.0  ;;  %vm507_vm7 = vcmp.eq.f32.partialorder %v1210_v5, 0.0  ;;  %vm552_vm8 = vcmp.lt.s32.totalorder %v1212_v6, 0 }
 0x17c   : > { %v883_v24 = vpop.eup %882 }
 0x17d   : > { %v885_v25 = vpop.eup %884  ;;  %v456_v26 = vmul.f32 %v883_v24, %v453_v10 }
 0x17e   : > { %v480_v27 = vmul.f32 %v885_v25, %v477_v11  ;;  %v887_v32 = vpop.eup %886 }
 0x17f   : > { %v458_v29 = vsel %vm457_vm14, %v453_v10, %v456_v26  ;;  %v889_v34 = vpop.eup %888  ;;  %v463_v36 = vmul.f32 %v887_v32, %v454_v19 }
 0x180   : > { %v481_v30 = vmul.f32 %v480_v27, %v480_v27  ;;  %v461_v31 = vsel %vm459_vm15, %v460_v28, %v458_v29  ;;  %v527_v38 = vmul.f32 %v889_v34, %v524_v21 }
 0x181   : > { %v469_v33 = vadd.f32 1e-10, %v461_v31  ;;  %v465_v40 = vsel %vm464_vm0, %v454_v19, %v463_v36 }
 0x182   : > { %v482_v35 = vmul.f32 0.002785687, %v481_v30  ;;  %v528_v41 = vmul.f32 %v527_v38, %v527_v38  ;;  %v468_v42 = vsel %vm466_vm1, %v467_v37, %v465_v40  ;;  %v1029_v37 = vmov 0.7853982  }
 0x183   : > { %890 = vlog2.f32 %v469_v33  ;;  %v470_v44 = vadd.f32 1e-10, %v468_v42  ;;  %v1028_v33 = vmov 0.0  }
 0x184   : > { %v483_v39 = vadd.f32 -0.015866, %v482_v35  ;;  %v529_v45 = vmul.f32 0.002785687, %v528_v41  ;;  %v506_v34 = vsel %vm505_vm4, 3.1415927, %v1028_v33 }
 0x185   : > { %892 = vlog2.f32 %v470_v44  ;;  %v553_v13 = vsel %vm552_vm8, 3.1415927, %v1028_v33 }
 0x186   : > { %v484_v43 = vmul.f32 %v483_v39, %v481_v30  ;;  %v530_v47 = vadd.f32 -0.015866, %v529_v45  ;;  %v514_v39 = vsel %vm502_vm5, 2.3561945, %v1029_v37 }
 0x188   : > { %v485_v46 = vadd.f32 0.04247222, %v484_v43  ;;  %v531_v49 = vmul.f32 %v530_v47, %v528_v41 }
 0x18a   : > { %v486_v48 = vmul.f32 %v485_v46, %v481_v30  ;;  %v532_v52 = vadd.f32 0.04247222, %v531_v49 }
 0x18c   : > { %v487_v50 = vadd.f32 -0.074975304, %v486_v48  ;;  %v533_v55 = vmul.f32 %v532_v52, %v528_v41 }
 0x18d   : > { %v891_v51 = vpop.eup %890 }
 0x18e   : > { %v488_v53 = vmul.f32 %v487_v50, %v481_v30  ;;  %v472_v54 = vmul.f32 0.6931472, %v891_v51  ;;  %v534_v57 = vadd.f32 -0.074975304, %v533_v55 }
 0x18f   : > { %v893_v58 = vpop.eup %892 }
 0x190   : > { %v489_v56 = vadd.f32 0.1064488, %v488_v53  ;;  %569 = vst [vmem:[%s1272_s17] sm:$0xf] %v472_v54  ;;  %v535_v60 = vmul.f32 %v534_v57, %v528_v41  ;;  %v474_v61 = vmul.f32 0.6931472, %v893_v58 }
 0x192   : > { %v490_v59 = vmul.f32 %v489_v56, %v481_v30  ;;  %v536_v63 = vadd.f32 0.1064488, %v535_v60  ;;  %570 = vst [vmem:[%s1272_s17 + $0x8] sm:$0xf] %v474_v61 }
 0x194   : > { %v491_v62 = vadd.f32 -0.14207031, %v490_v59  ;;  %v537_v1 = vmul.f32 %v536_v63, %v528_v41 }
 0x196   : > { %v492_v0 = vmul.f32 %v491_v62, %v481_v30  ;;  %v538_v7 = vadd.f32 -0.14207031, %v537_v1 }
 0x198   : > { %v493_v3 = vadd.f32 0.19993454, %v492_v0  ;;  %v539_v11 = vmul.f32 %v538_v7, %v528_v41 }
 0x19a   : > { %v494_v10 = vmul.f32 %v493_v3, %v481_v30  ;;  %v540_v14 = vadd.f32 0.19993454, %v539_v11 }
 0x19c   : > { %v495_v12 = vadd.f32 -0.33333147, %v494_v10  ;;  %v541_v19 = vmul.f32 %v540_v14, %v528_v41 }
 0x19e   : > { %v496_v17 = vmul.f32 %v495_v12, %v481_v30  ;;  %v542_v22 = vadd.f32 -0.33333147, %v541_v19 }
 0x1a0   : > { %v497_v21 = vmul.f32 %v496_v17, %v480_v27  ;;  %v543_v25 = vmul.f32 %v542_v22, %v528_v41 }
 0x1a2   : > { %v498_v24 = vadd.f32 %v497_v21, %v480_v27  ;;  %v544_v28 = vmul.f32 %v543_v25, %v527_v38 }
 0x1a4   : > { %v500_v26 = vsub.f32 1.5707964, %v498_v24  ;;  %v545_v32 = vadd.f32 %v544_v28, %v527_v38  ;;  %v520_v38 = vand.u32 2147483648, %v1210_v5 }
 0x1a6   : > { %v501_v29 = vsel %vm499_vm2, %v500_v26, %v498_v24  ;;  %v547_v35 = vsub.f32 1.5707964, %v545_v32  ;;  %vm549_vm2 = vcmp.lt.f32.partialorder %v1212_v6, 0.0  ;;  %v567_v6 = vand.u32 2147483648, %v1221_v9 }
 0x1a7   : > { %v503_v31 = vsub.f32 3.1415927, %v501_v29  ;;  %v561_v18 = vsel %vm549_vm2, 2.3561945, %v1029_v37 }
 0x1a8   : > { %v548_v4 = vsel %vm546_vm11, %v547_v35, %v545_v32 }
 0x1a9   : > { %v504_v30 = vsel %vm502_vm5, %v503_v31, %v501_v29  ;;  %v550_v8 = vsub.f32 3.1415927, %v548_v4 }
 0x1aa   : > { %v508_v27 = vsel %vm507_vm7, %v506_v34, %v504_v30 }
 0x1ab   : > { %v512_v36 = vsel %vm1231_vm3, nan, %v508_v27  ;;  %v551_v41 = vsel %vm549_vm2, %v550_v8, %v548_v4  ;;  %vm554_vm3 = vcmp.eq.f32.partialorder %v1221_v9, 0.0 }
 0x1ac   : > { %v518_v2 = vsel %vm1242_vm6, %v514_v39, %v512_v36  ;;  %v555_v15 = vsel %vm554_vm3, %v553_v13, %v551_v41 }
 0x1ad   : > { %v519_v40 = vand.u32 2147483647, %v518_v2  ;;  %v559_v16 = vsel %vm1256_vm10, nan, %v555_v15 }
 0x1ae   : > { %v565_v5 = vsel %vm1267_vm13, %v561_v18, %v559_v16 }
 0x1af   : > { %v521_v42 = vor.u32 %v520_v38, %v519_v40  ;;  %v566_v44 = vand.u32 2147483647, %v565_v5 }
 0x1b1   : > { %v573_v43 = vrot.slane %v521_v42, 4  ;;  %v568_v45 = vor.u32 %v567_v6, %v566_v44 }
 0x1b3   : > { %577 = vst [vmem:[%s1272_s17] sm:$0xf0] %v573_v43  ;;  %v574_v46 = vrot.slane %v568_v45, 4 }
 0x1b5   : > { %578 = vst [vmem:[%s1272_s17 + $0x8] sm:$0xf0] %v574_v46 }
 0x1b6   : > { %965 = shalt.err (!%p962_p7)
}
 0x1b7   : > { %s966_s7 = scalar_lea.hbm %s1304_s30, 256  ;;  %s970_s25 = scalar_lea.hbm %s1351_s2, 512 }
 0x1b8   : > { %p967_p9 = scmp.ne.s32.totalorder %s1304_s30, %s966_s7  ;;  %p971_p0 = scmp.lt.u32.totalorder %s1304_s30, %s1351_s2 }
 0x1b9   : > { %p972_p11 = scmp.lt.u32.totalorder %s970_s25, %s966_s7  ;;  %p974_p4 = scmp.lt.u32.totalorder %s966_s7, %s1304_s30 }
 0x1ba   : > { %p968_p2 = pnand %p967_p9, %p1137_p12 }
 0x1bb   : > { %p973_p1 = por %p972_p11, %p971_p0 }
 0x1bc   : > { %p969_p5 = pneg %p968_p2 }
 0x1bd   : > { %p975_p6 = por %p974_p4, %p973_p1 }
 0x1bf   : > { %p976_p8 = pnand %p975_p6, %p969_p5 }
 0x1c1   : > { %979 = shalt.err (!%p976_p8)
}
 0x1c2   : > { %826 = dma.vmem_to_hbm [thread:$0]  (%p1137_p12), %s1306_s22, 256, %s1304_s30, %s580_s3  }
 0x1c3 PF: > { %s606_s19 = sand.u32 1, %s1010_s9   ;;  %p1374_p10 = scmp.ne.s32.totalorder %s1356_s16, 0 }
 0x1c4   : > { %p1375_p13 = scmp.ge.s32.totalorder %s1022_s12, 2  ;;  %s607_s29 = scalar_lea.sflag [#allocation4], %s606_s19 }
 0x1c6   : > { %p837_p3 = pnand %p1375_p13, %p1374_p10 }
 0x1c8   : > { %1005 = dma.done.wait (!%p837_p3), %s607_s29, 256  }
 0x1c9   : > { %1007 = vsyncadd (!%p837_p3), %s607_s29, 4294967040  ;;  %p16_p7 = scmp.ge.s32.totalorder %s1102_s21, 4   ;;  %s1376_s9 = smov %s1014_s10 }
 0x1ca   : > { %s1377_s10 = smov %s1018_s11  ;;  %s1378_s11 = smov %s1133_s8 }
 0x1cb   : > { %s1379_s12 = smov %s1102_s21  ;;  %18 = sbr.rel (!%p16_p7) target bundleno = 6 (0x6), region = 77 }
 0x1d2   :  { %612 = vsyncpa [#allocation3], 1 }
 0x1d3   :  { %614 = vsyncpa [#allocation3 + $0x1], 1 }
 0x1d4   :  { %615 = vsyncpa [#allocation6], 1 }
 0x1d5   :  { %616 = vsyncpa [#allocation4], 1 }
 0x1d6   :  { %618 = vsyncpa [#allocation4 + $0x1], 1 }

</bundles_post_ra>
